<compile_context>
chip_gen: v7x
topology: tpu7x:2x2x1
jax: 0.10.0
libtpu: 0.0.40
codegen_flags: <defaults>
</compile_context>

<pallas_src>
import functools

import jax
import jax.numpy as jnp
from jax.experimental import pallas as pl
from jax.experimental.pallas import tpu as pltpu


D_GNN = 64          # GNN feature width (fixed by the reference module)


def _choose_gb(batch, n_nodes):
    """Graphs packed per grid step.

    Fill the MXU M-dimension (target GB*N ~ 512 rows for the block-diag
    propagation and the h@W matmuls) while keeping the (GB*N)^2 block-diag
    scratch small and keeping the grid length >= 2 when the batch allows it
    (v7x megacore).  For tiny batches (<= 8) use a single step.
    """
    if batch <= 8:
        return batch
    gb = 8
    while gb * 2 * n_nodes <= 512 and gb * 2 <= 128:
        gb *= 2
    while gb > 8 and pl.cdiv(batch, gb) < 2:
        gb //= 2
    return gb


# ----------------------------------------------------------------------------
# Fused kernel: emb -> (block-diag norm adj) -> 4x GCN -> sum-pool -> Linears2
#               -> concat(hidden) -> Linears3
# ----------------------------------------------------------------------------
def _fused_solvent_kernel(adj_ref, x_ref, hid_ref, w_emb_ref, b_emb_ref,
                          w_gcn_ref, b_gcn_ref, w_lin2_ref, b_lin2_ref,
                          *rest, n_gcn, n_lin2, n_lin3, out_dim):
    lin3_refs = rest[:2 * n_lin3]
    o_ref = rest[2 * n_lin3]
    a_bd_ref = rest[2 * n_lin3 + 1]          # (GB*N, GB*N) bf16 scratch

    GB, N, node_dim = x_ref.shape
    D = w_emb_ref.shape[1]
    M = GB * N
    f32, bf16 = jnp.float32, jnp.bfloat16

    # ---- normalized adjacency, built ONCE per grid step --------------------
    # A_hat = D^-1/2 (A + I) D^-1/2 ; self-loops folded algebraically:
    # off-diagonal part (dinv_i * A_ij * dinv_j) goes into the block-diag
    # scratch, diagonal part (dinv_i^2) is applied as `d2 * h` per layer,
    # so no identity / iota is materialized.
    adj = adj_ref[...].astype(f32)                        # (GB, N, N), 0/1
    deg = jnp.sum(adj, axis=-1, keepdims=True) + 1.0      # +1 for self loop
    dinv = jax.lax.rsqrt(deg)                             # (GB, N, 1)  f32
    a_hat = ((dinv * adj) * dinv.reshape(GB, 1, N)).astype(bf16)
    d2 = (dinv * dinv).reshape(M, 1)                      # diag(A_hat), f32

    # Block-diagonal propagation matrix in VMEM: ONE (M,M)@(M,D) matmul per
    # GCN layer instead of GB tiny (N,N)@(N,D) matmuls.  Zeroed every step so
    # megacore grid-sharding (v7x) never reads a stale/uninitialized scratch.
    a_bd_ref[...] = jnp.zeros_like(a_bd_ref)
    for g in range(GB):
        a_bd_ref[g * N:(g + 1) * N, g * N:(g + 1) * N] = a_hat[g]
    a_bd = a_bd_ref[...]

    # ---- node_embedding_solv: h = x @ W_emb + b (row-packed GB*N x D) ------
    x = x_ref[...].reshape(M, node_dim)
    h = jnp.dot(x.astype(bf16), w_emb_ref[...],
                preferred_element_type=f32) + b_emb_ref[...]          # f32

    # ---- GCNs_solv: n_gcn x residual ReLU GraphConv, h stays resident ------
    for l in range(n_gcn):
        hs = h.astype(bf16)
        ah = jnp.dot(a_bd, hs, preferred_element_type=f32) + d2 * h   # A_hat h
        y = jnp.dot(ah.astype(bf16), w_gcn_ref[l],
                    preferred_element_type=f32) + b_gcn_ref[l]
        h = jnp.maximum(y, 0.0) + h                                   # residual

    # ---- SumPooling over nodes ---------------------------------------------
    # TODO(synk): assumes dense-batched graphs with all N nodes valid; a
    #             per-graph node-validity mask is needed for node-padded graphs.
    pooled = jnp.sum(h.reshape(GB, N, D), axis=1)                     # (GB, D)

    # ---- Linears2: n_lin2 x (Linear(64,64) + ReLU) --------------------------
    for l in range(n_lin2):
        y = jnp.dot(pooled.astype(bf16), w_lin2_ref[l],
                    preferred_element_type=f32) + b_lin2_ref[l]
        pooled = jnp.maximum(y, 0.0)

    # ---- concat(hidden, h_solv) + Linears3 epilogue (kept in-kernel) --------
    t = jnp.concatenate([hid_ref[...], pooled], axis=-1)              # (GB, H+64)
    for l in range(n_lin3):
        w3 = lin3_refs[2 * l]
        b3 = lin3_refs[2 * l + 1]
        t = jnp.dot(t.astype(bf16), w3[...],
                    preferred_element_type=f32) + b3[...]
        if l < n_lin3 - 1:
            t = jnp.maximum(t, 0.0)

    # ---- lane-dense 128-wide store; wrapper slices [:, :out_dim] ------------
    out_w = o_ref.shape[-1]
    if out_w > out_dim:
        t = jnp.concatenate([t, jnp.zeros((GB, out_w - out_dim), f32)], axis=-1)
    o_ref[...] = t


# ----------------------------------------------------------------------------
# Wrapper: padding, bf16 packing, BlockSpecs, cost/VMEM budgeting
# ----------------------------------------------------------------------------
def fused_solvent_layer(params, hidden_feats, solv_adj, solv_node_feats):
    """Full SolventLayer forward (eval mode) in one pallas_call.

    solv_adj: (B, N, N) dense 0/1 adjacency (no self loops; added in kernel).
    solv_node_feats: (B, N, node_dim).  hidden_feats: (B, H).
    Returns (B, target_dim) float32.
    """
    B, N, node_dim = solv_node_feats.shape
    H = hidden_feats.shape[1]
    D = D_GNN
    f32, bf16 = jnp.float32, jnp.bfloat16

    n_gcn = len(params["gcn"])
    n_lin2 = len(params["lin2"])
    n_lin3 = len(params["lin3"])
    out_dim = params["lin3"][-1][0].shape[1]
    out_pad = max(128, pl.cdiv(out_dim, 128) * 128)

    GB = _choose_gb(B, N)
    B_pad = pl.cdiv(B, GB) * GB
    if B_pad != B:
        pad_b = B_pad - B
        solv_adj = jnp.pad(solv_adj, ((0, pad_b), (0, 0), (0, 0)))
        solv_node_feats = jnp.pad(solv_node_feats, ((0, pad_b), (0, 0), (0, 0)))
        hidden_feats = jnp.pad(hidden_feats, ((0, pad_b), (0, 0)))

    # Weights as bf16 (MXU operands, resident across grid steps); biases f32.
    # Adjacency is 0/1 so bf16 is exact and halves its DMA/VMEM footprint.
    adj_bf = solv_adj.astype(bf16)
    w_emb, b_emb = params["emb_solv"]
    w_emb = w_emb.astype(bf16)
    b_emb = b_emb.reshape(1, D).astype(f32)
    w_gcn = jnp.stack([w for w, _ in params["gcn"]]).astype(bf16)
    b_gcn = jnp.stack([b.reshape(1, D) for _, b in params["gcn"]]).astype(f32)
    w_lin2 = jnp.stack([w for w, _ in params["lin2"]]).astype(bf16)
    b_lin2 = jnp.stack([b.reshape(1, D) for _, b in params["lin2"]]).astype(f32)

    lin3_ops, lin3_specs = [], []
    for w, b in params["lin3"]:
        din, dout = w.shape
        lin3_ops += [w.astype(bf16), b.reshape(1, dout).astype(f32)]
        lin3_specs += [pl.BlockSpec((din, dout), lambda i: (0, 0)),
                       pl.BlockSpec((1, dout), lambda i: (0, 0))]

    steps = B_pad // GB
    M = GB * N
    flops = steps * (
        2 * M * node_dim * D
        + n_gcn * (2 * M * M * D + 2 * M * D * D)
        + n_lin2 * 2 * GB * D * D
        + sum(2 * GB * w.shape[0] * w.shape[1] for w, _ in params["lin3"]))
    weight_bytes = sum(int(a.size) * jnp.dtype(a.dtype).itemsize
                       for a in [w_emb, b_emb, w_gcn, b_gcn, w_lin2, b_lin2]
                       + lin3_ops)
    bytes_accessed = (int(adj_bf.size) * 2 + int(solv_node_feats.size) * 4
                      + int(hidden_feats.size) * 4 + B_pad * out_pad * 4
                      + weight_bytes)

    # Explicit VMEM budget: double-buffered in/out blocks + resident weights +
    # block-diag scratch, x2 headroom, capped below v7x's 64 MiB physical.
    block_bytes = 2 * (GB * N * N * 2 + GB * N * node_dim * 4
                       + GB * H * 4 + GB * out_pad * 4)
    scratch_bytes = M * M * 2
    vmem_limit = int(min(48 * 1024 * 1024,
                         max(32 * 1024 * 1024,
                             2 * (block_bytes + scratch_bytes + weight_bytes))))

    kernel = functools.partial(_fused_solvent_kernel, n_gcn=n_gcn,
                               n_lin2=n_lin2, n_lin3=n_lin3, out_dim=out_dim)

    out = pl.pallas_call(
        kernel,
        out_shape=jax.ShapeDtypeStruct((B_pad, out_pad), f32),
        grid=(steps,),
        in_specs=[
            pl.BlockSpec((GB, N, N), lambda i: (i, 0, 0)),          # adjacency
            pl.BlockSpec((GB, N, node_dim), lambda i: (i, 0, 0)),   # node feats
            pl.BlockSpec((GB, H), lambda i: (i, 0)),                # hidden feats
            pl.BlockSpec((node_dim, D), lambda i: (0, 0)),          # W_emb
            pl.BlockSpec((1, D), lambda i: (0, 0)),                 # b_emb
            pl.BlockSpec((n_gcn, D, D), lambda i: (0, 0, 0)),       # W_gcn
            pl.BlockSpec((n_gcn, 1, D), lambda i: (0, 0, 0)),       # b_gcn
            pl.BlockSpec((n_lin2, D, D), lambda i: (0, 0, 0)),      # W_lin2
            pl.BlockSpec((n_lin2, 1, D), lambda i: (0, 0, 0)),      # b_lin2
        ] + lin3_specs,
        out_specs=pl.BlockSpec((GB, out_pad), lambda i: (i, 0)),
        scratch_shapes=[pltpu.VMEM((M, M), bf16)],
        compiler_params=pltpu.CompilerParams(
            dimension_semantics=("parallel",),
            vmem_limit_bytes=vmem_limit),
        cost_estimate=pl.CostEstimate(
            flops=int(flops),
            transcendentals=int(B_pad * N),
            bytes_accessed=int(bytes_accessed)),
    )(adj_bf, solv_node_feats, hidden_feats, w_emb, b_emb,
      w_gcn, b_gcn, w_lin2, b_lin2, *lin3_ops)

    return out[:B, :out_dim]


# ----------------------------------------------------------------------------
# Parameter construction (deterministic, synthetic)
# ----------------------------------------------------------------------------
def init_params(key, node_dim, hidden_dim, target_dim, n_gcn=4, n_lin3=2):
    def dense(k, fin, fout):
        kw, _ = jax.random.split(k)
        scale = 1.0 / jnp.sqrt(jnp.float32(fin))
        w = jax.random.normal(kw, (fin, fout), jnp.float32) * scale
        b = jnp.zeros((fout,), jnp.float32)
        return w, b

    keys = jax.random.split(key, 16)
    params = {}
    # node_embedding (declared in __init__ but unused in forward) -- skipped.
    params["emb_solv"] = dense(keys[0], node_dim, D_GNN)
    params["gcn"] = [dense(keys[1 + i], D_GNN, D_GNN) for i in range(n_gcn)]
    params["lin2"] = [dense(keys[6 + i], D_GNN, D_GNN) for i in range(2)]
    # Linears3: (hidden_dim + 64) -> ... -> target_dim, last layer no activation
    lin3 = []
    din = hidden_dim + D_GNN
    for i in range(n_lin3 - 1):
        lin3.append(dense(keys[9 + i], din, din))
    lin3.append(dense(keys[9 + n_lin3 - 1], din, target_dim))
    params["lin3"] = lin3
    return params


def solvent_layer_forward(params, hidden_feats, solv_adj, solv_node_feats):
    # Whole forward (GNN stack + concat + Linears3) runs in one pallas_call.
    return fused_solvent_layer(params, hidden_feats, solv_adj, solv_node_feats)


# ----------------------------------------------------------------------------
if __name__ == "__main__":
    B = 2            # number of graphs / batch
    N = 16           # nodes per (dense-batched) solvent graph
    node_dim = 32
    hidden_dim = 64
    target_dim = 8

    key = jax.random.PRNGKey(0)
    k_p, k_h, k_x, k_a = jax.random.split(key, 4)

    params = init_params(k_p, node_dim, hidden_dim, target_dim)

    hidden_feats = jax.random.normal(k_h, (B, hidden_dim), jnp.float32)
    solv_node_feats = jax.random.normal(k_x, (B, N, node_dim), jnp.float32)
    # random symmetric 0/1 adjacency (no self loops; normalization adds them)
    a_rand = jax.random.uniform(k_a, (B, N, N))
    adj = (a_rand > 0.7).astype(jnp.float32)
    adj = jnp.maximum(adj, jnp.swapaxes(adj, 1, 2))
    adj = adj * (1.0 - jnp.eye(N, dtype=jnp.float32)[None])

    fwd = jax.jit(solvent_layer_forward)
    out = fwd(params, hidden_feats, adj, solv_node_feats)
    out = jax.block_until_ready(out)
    assert out.shape == (B, target_dim), out.shape
    assert jnp.all(jnp.isfinite(out))
    print("KERNEL_OK")
</pallas_src>

<mosaic_0001>
module attributes {stable_mosaic.version = 11 : i64} {
  func.func @_fused_solvent_kernel(%arg0: i32, %arg1: memref<2x16x16xbf16, #tpu.memory_space<vmem>>, %arg2: memref<2x16x32xf32, #tpu.memory_space<vmem>>, %arg3: memref<2x64xf32, #tpu.memory_space<vmem>>, %arg4: memref<32x64xbf16, #tpu.memory_space<vmem>>, %arg5: memref<1x64xf32, #tpu.memory_space<vmem>>, %arg6: memref<4x64x64xbf16, #tpu.memory_space<vmem>>, %arg7: memref<4x1x64xf32, #tpu.memory_space<vmem>>, %arg8: memref<2x64x64xbf16, #tpu.memory_space<vmem>>, %arg9: memref<2x1x64xf32, #tpu.memory_space<vmem>>, %arg10: memref<128x128xbf16, #tpu.memory_space<vmem>>, %arg11: memref<1x128xf32, #tpu.memory_space<vmem>>, %arg12: memref<128x8xbf16, #tpu.memory_space<vmem>>, %arg13: memref<1x8xf32, #tpu.memory_space<vmem>>, %arg14: memref<2x128xf32, #tpu.memory_space<vmem>>, %arg15: memref<32x32xbf16, #tpu.memory_space<vmem>>) attributes {dimension_semantics = [#tpu.dimension_semantics<parallel>], iteration_bounds = array<i64: 1>, scalar_prefetch = 0 : i64, scratch_operands = 1 : i64, tpu.core_type = #tpu.core_type<tc>, window_params = [{transform_indices = @transform_0, window_bounds = array<i64: 2, 16, 16>}, {transform_indices = @transform_1, window_bounds = array<i64: 2, 16, 32>}, {transform_indices = @transform_2, window_bounds = array<i64: 2, 64>}, {pipeline_mode = #tpu.pipeline_mode<synchronous>, transform_indices = @transform_3, window_bounds = array<i64: 32, 64>}, {pipeline_mode = #tpu.pipeline_mode<synchronous>, transform_indices = @transform_4, window_bounds = array<i64: 1, 64>}, {pipeline_mode = #tpu.pipeline_mode<synchronous>, transform_indices = @transform_5, window_bounds = array<i64: 4, 64, 64>}, {pipeline_mode = #tpu.pipeline_mode<synchronous>, transform_indices = @transform_6, window_bounds = array<i64: 4, 1, 64>}, {pipeline_mode = #tpu.pipeline_mode<synchronous>, transform_indices = @transform_7, window_bounds = array<i64: 2, 64, 64>}, {pipeline_mode = #tpu.pipeline_mode<synchronous>, transform_indices = @transform_8, window_bounds = array<i64: 2, 1, 64>}, {pipeline_mode = #tpu.pipeline_mode<synchronous>, transform_indices = @transform_9, window_bounds = array<i64: 128, 128>}, {pipeline_mode = #tpu.pipeline_mode<synchronous>, transform_indices = @transform_10, window_bounds = array<i64: 1, 128>}, {pipeline_mode = #tpu.pipeline_mode<synchronous>, transform_indices = @transform_11, window_bounds = array<i64: 128, 8>}, {pipeline_mode = #tpu.pipeline_mode<synchronous>, transform_indices = @transform_12, window_bounds = array<i64: 1, 8>}, {transform_indices = @transform_13, window_bounds = array<i64: 2, 128>}]} {
    %c0 = arith.constant 0 : index
    %c0_0 = arith.constant 0 : index
    %c0_1 = arith.constant 0 : index
    %0 = vector.load %arg1[%c0, %c0_0, %c0_1] : memref<2x16x16xbf16, #tpu.memory_space<vmem>>, vector<2x16x16xbf16>
    %1 = arith.extf %0 : vector<2x16x16xbf16> to vector<2x16x16xf32>
    %cst = arith.constant dense<0.000000e+00> : vector<2x16xf32>
    %2 = vector.multi_reduction <add>, %1, %cst [2] : vector<2x16x16xf32> to vector<2x16xf32>
    %3 = vector.shape_cast %2 : vector<2x16xf32> to vector<2x16x1xf32>
    %cst_2 = arith.constant 1.000000e+00 : f32
    %4 = vector.broadcast %cst_2 : f32 to vector<2x16x1xf32>
    %5 = arith.addf %3, %4 : vector<2x16x1xf32>
    %6 = math.rsqrt %5 : vector<2x16x1xf32>
    %7 = vector.broadcast %6 : vector<2x16x1xf32> to vector<2x16x16xf32>
    %8 = arith.mulf %7, %1 : vector<2x16x16xf32>
    %9 = vector.shape_cast %6 : vector<2x16x1xf32> to vector<2x1x16xf32>
    %10 = vector.broadcast %9 : vector<2x1x16xf32> to vector<2x16x16xf32>
    %11 = arith.mulf %8, %10 : vector<2x16x16xf32>
    %12 = arith.truncf %11 : vector<2x16x16xf32> to vector<2x16x16xbf16>
    %13 = arith.mulf %6, %6 : vector<2x16x1xf32>
    %14 = vector.shape_cast %13 : vector<2x16x1xf32> to vector<32x1xf32>
    %cst_3 = arith.constant 0.000000e+00 : bf16
    %15 = vector.broadcast %cst_3 : bf16 to vector<32x32xbf16>
    %c0_4 = arith.constant 0 : index
    %c0_5 = arith.constant 0 : index
    %16 = vector.load %arg15[%c0_4, %c0_5] : memref<32x32xbf16, #tpu.memory_space<vmem>>, vector<32x32xbf16>
    tpu.vector_store %arg15[%c0_4, %c0_5], %15 {strides = array<i32>} : memref<32x32xbf16, #tpu.memory_space<vmem>>, vector<32x32xbf16>,
    %17 = vector.extract_strided_slice %12 {offsets = [0, 0, 0], sizes = [1, 16, 16], strides = [1, 1, 1]} : vector<2x16x16xbf16> to vector<1x16x16xbf16>
    %18 = vector.shape_cast %17 : vector<1x16x16xbf16> to vector<16x16xbf16>
    %c0_6 = arith.constant 0 : index
    %c0_7 = arith.constant 0 : index
    %19 = vector.load %arg15[%c0_6, %c0_7] : memref<32x32xbf16, #tpu.memory_space<vmem>>, vector<16x16xbf16>
    tpu.vector_store %arg15[%c0_6, %c0_7], %18 {strides = array<i32>} : memref<32x32xbf16, #tpu.memory_space<vmem>>, vector<16x16xbf16>,
    %20 = vector.extract_strided_slice %12 {offsets = [1, 0, 0], sizes = [1, 16, 16], strides = [1, 1, 1]} : vector<2x16x16xbf16> to vector<1x16x16xbf16>
    %21 = vector.shape_cast %20 : vector<1x16x16xbf16> to vector<16x16xbf16>
    %c16 = arith.constant 16 : index
    %c16_8 = arith.constant 16 : index
    %22 = vector.load %arg15[%c16, %c16_8] : memref<32x32xbf16, #tpu.memory_space<vmem>>, vector<16x16xbf16>
    tpu.vector_store %arg15[%c16, %c16_8], %21 {strides = array<i32>} : memref<32x32xbf16, #tpu.memory_space<vmem>>, vector<16x16xbf16>,
    %c0_9 = arith.constant 0 : index
    %c0_10 = arith.constant 0 : index
    %23 = vector.load %arg15[%c0_9, %c0_10] : memref<32x32xbf16, #tpu.memory_space<vmem>>, vector<32x32xbf16>
    %c0_11 = arith.constant 0 : index
    %c0_12 = arith.constant 0 : index
    %c0_13 = arith.constant 0 : index
    %24 = vector.load %arg2[%c0_11, %c0_12, %c0_13] : memref<2x16x32xf32, #tpu.memory_space<vmem>>, vector<2x16x32xf32>
    %25 = vector.shape_cast %24 : vector<2x16x32xf32> to vector<32x32xf32>
    %26 = arith.truncf %25 : vector<32x32xf32> to vector<32x32xbf16>
    %c0_14 = arith.constant 0 : index
    %c0_15 = arith.constant 0 : index
    %27 = vector.load %arg4[%c0_14, %c0_15] : memref<32x64xbf16, #tpu.memory_space<vmem>>, vector<32x64xbf16>
    %cst_16 = arith.constant dense<0.000000e+00> : vector<32x64xf32>
    %28 = tpu.matmul %26, %27, %cst_16 {dimension_numbers = #tpu.dot_dimension_numbers<[1], [0], [0], [1], [0, 0, 1, 1], [], []>} : vector<32x32xbf16>, vector<32x64xbf16>, vector<32x64xf32> -> vector<32x64xf32>
    %c0_17 = arith.constant 0 : index
    %c0_18 = arith.constant 0 : index
    %29 = vector.load %arg5[%c0_17, %c0_18] : memref<1x64xf32, #tpu.memory_space<vmem>>, vector<1x64xf32>
    %30 = vector.broadcast %29 : vector<1x64xf32> to vector<32x64xf32>
    %31 = arith.addf %28, %30 : vector<32x64xf32>
    %32 = arith.truncf %31 : vector<32x64xf32> to vector<32x64xbf16>
    %cst_19 = arith.constant dense<0.000000e+00> : vector<32x64xf32>
    %33 = tpu.matmul %23, %32, %cst_19 {dimension_numbers = #tpu.dot_dimension_numbers<[1], [0], [0], [1], [0, 0, 1, 1], [], []>} : vector<32x32xbf16>, vector<32x64xbf16>, vector<32x64xf32> -> vector<32x64xf32>
    %34 = vector.broadcast %14 : vector<32x1xf32> to vector<32x64xf32>
    %35 = arith.mulf %34, %31 : vector<32x64xf32>
    %36 = arith.addf %33, %35 : vector<32x64xf32>
    %37 = arith.truncf %36 : vector<32x64xf32> to vector<32x64xbf16>
    %c0_20 = arith.constant 0 : index
    %c0_21 = arith.constant 0 : index
    %c0_22 = arith.constant 0 : index
    %38 = vector.load %arg6[%c0_20, %c0_21, %c0_22] : memref<4x64x64xbf16, #tpu.memory_space<vmem>>, vector<1x64x64xbf16>
    %39 = vector.shape_cast %38 : vector<1x64x64xbf16> to vector<64x64xbf16>
    %cst_23 = arith.constant dense<0.000000e+00> : vector<32x64xf32>
    %40 = tpu.matmul %37, %39, %cst_23 {dimension_numbers = #tpu.dot_dimension_numbers<[1], [0], [0], [1], [0, 0, 1, 1], [], []>} : vector<32x64xbf16>, vector<64x64xbf16>, vector<32x64xf32> -> vector<32x64xf32>
    %c0_24 = arith.constant 0 : index
    %c0_25 = arith.constant 0 : index
    %c0_26 = arith.constant 0 : index
    %41 = vector.load %arg7[%c0_24, %c0_25, %c0_26] : memref<4x1x64xf32, #tpu.memory_space<vmem>>, vector<1x1x64xf32>
    %42 = vector.shape_cast %41 : vector<1x1x64xf32> to vector<1x64xf32>
    %43 = vector.broadcast %42 : vector<1x64xf32> to vector<32x64xf32>
    %44 = arith.addf %40, %43 : vector<32x64xf32>
    %cst_27 = arith.constant 0.000000e+00 : f32
    %45 = vector.broadcast %cst_27 : f32 to vector<32x64xf32>
    %46 = arith.maximumf %44, %45 : vector<32x64xf32>
    %47 = arith.addf %46, %31 : vector<32x64xf32>
    %48 = arith.truncf %47 : vector<32x64xf32> to vector<32x64xbf16>
    %cst_28 = arith.constant dense<0.000000e+00> : vector<32x64xf32>
    %49 = tpu.matmul %23, %48, %cst_28 {dimension_numbers = #tpu.dot_dimension_numbers<[1], [0], [0], [1], [0, 0, 1, 1], [], []>} : vector<32x32xbf16>, vector<32x64xbf16>, vector<32x64xf32> -> vector<32x64xf32>
    %50 = vector.broadcast %14 : vector<32x1xf32> to vector<32x64xf32>
    %51 = arith.mulf %50, %47 : vector<32x64xf32>
    %52 = arith.addf %49, %51 : vector<32x64xf32>
    %53 = arith.truncf %52 : vector<32x64xf32> to vector<32x64xbf16>
    %c1 = arith.constant 1 : index
    %c0_29 = arith.constant 0 : index
    %c0_30 = arith.constant 0 : index
    %54 = vector.load %arg6[%c1, %c0_29, %c0_30] : memref<4x64x64xbf16, #tpu.memory_space<vmem>>, vector<1x64x64xbf16>
    %55 = vector.shape_cast %54 : vector<1x64x64xbf16> to vector<64x64xbf16>
    %cst_31 = arith.constant dense<0.000000e+00> : vector<32x64xf32>
    %56 = tpu.matmul %53, %55, %cst_31 {dimension_numbers = #tpu.dot_dimension_numbers<[1], [0], [0], [1], [0, 0, 1, 1], [], []>} : vector<32x64xbf16>, vector<64x64xbf16>, vector<32x64xf32> -> vector<32x64xf32>
    %c1_32 = arith.constant 1 : index
    %c0_33 = arith.constant 0 : index
    %c0_34 = arith.constant 0 : index
    %57 = vector.load %arg7[%c1_32, %c0_33, %c0_34] : memref<4x1x64xf32, #tpu.memory_space<vmem>>, vector<1x1x64xf32>
    %58 = vector.shape_cast %57 : vector<1x1x64xf32> to vector<1x64xf32>
    %59 = vector.broadcast %58 : vector<1x64xf32> to vector<32x64xf32>
    %60 = arith.addf %56, %59 : vector<32x64xf32>
    %cst_35 = arith.constant 0.000000e+00 : f32
    %61 = vector.broadcast %cst_35 : f32 to vector<32x64xf32>
    %62 = arith.maximumf %60, %61 : vector<32x64xf32>
    %63 = arith.addf %62, %47 : vector<32x64xf32>
    %64 = arith.truncf %63 : vector<32x64xf32> to vector<32x64xbf16>
    %cst_36 = arith.constant dense<0.000000e+00> : vector<32x64xf32>
    %65 = tpu.matmul %23, %64, %cst_36 {dimension_numbers = #tpu.dot_dimension_numbers<[1], [0], [0], [1], [0, 0, 1, 1], [], []>} : vector<32x32xbf16>, vector<32x64xbf16>, vector<32x64xf32> -> vector<32x64xf32>
    %66 = vector.broadcast %14 : vector<32x1xf32> to vector<32x64xf32>
    %67 = arith.mulf %66, %63 : vector<32x64xf32>
    %68 = arith.addf %65, %67 : vector<32x64xf32>
    %69 = arith.truncf %68 : vector<32x64xf32> to vector<32x64xbf16>
    %c2 = arith.constant 2 : index
    %c0_37 = arith.constant 0 : index
    %c0_38 = arith.constant 0 : index
    %70 = vector.load %arg6[%c2, %c0_37, %c0_38] : memref<4x64x64xbf16, #tpu.memory_space<vmem>>, vector<1x64x64xbf16>
    %71 = vector.shape_cast %70 : vector<1x64x64xbf16> to vector<64x64xbf16>
    %cst_39 = arith.constant dense<0.000000e+00> : vector<32x64xf32>
    %72 = tpu.matmul %69, %71, %cst_39 {dimension_numbers = #tpu.dot_dimension_numbers<[1], [0], [0], [1], [0, 0, 1, 1], [], []>} : vector<32x64xbf16>, vector<64x64xbf16>, vector<32x64xf32> -> vector<32x64xf32>
    %c2_40 = arith.constant 2 : index
    %c0_41 = arith.constant 0 : index
    %c0_42 = arith.constant 0 : index
    %73 = vector.load %arg7[%c2_40, %c0_41, %c0_42] : memref<4x1x64xf32, #tpu.memory_space<vmem>>, vector<1x1x64xf32>
    %74 = vector.shape_cast %73 : vector<1x1x64xf32> to vector<1x64xf32>
    %75 = vector.broadcast %74 : vector<1x64xf32> to vector<32x64xf32>
    %76 = arith.addf %72, %75 : vector<32x64xf32>
    %cst_43 = arith.constant 0.000000e+00 : f32
    %77 = vector.broadcast %cst_43 : f32 to vector<32x64xf32>
    %78 = arith.maximumf %76, %77 : vector<32x64xf32>
    %79 = arith.addf %78, %63 : vector<32x64xf32>
    %80 = arith.truncf %79 : vector<32x64xf32> to vector<32x64xbf16>
    %cst_44 = arith.constant dense<0.000000e+00> : vector<32x64xf32>
    %81 = tpu.matmul %23, %80, %cst_44 {dimension_numbers = #tpu.dot_dimension_numbers<[1], [0], [0], [1], [0, 0, 1, 1], [], []>} : vector<32x32xbf16>, vector<32x64xbf16>, vector<32x64xf32> -> vector<32x64xf32>
    %82 = vector.broadcast %14 : vector<32x1xf32> to vector<32x64xf32>
    %83 = arith.mulf %82, %79 : vector<32x64xf32>
    %84 = arith.addf %81, %83 : vector<32x64xf32>
    %85 = arith.truncf %84 : vector<32x64xf32> to vector<32x64xbf16>
    %c3 = arith.constant 3 : index
    %c0_45 = arith.constant 0 : index
    %c0_46 = arith.constant 0 : index
    %86 = vector.load %arg6[%c3, %c0_45, %c0_46] : memref<4x64x64xbf16, #tpu.memory_space<vmem>>, vector<1x64x64xbf16>
    %87 = vector.shape_cast %86 : vector<1x64x64xbf16> to vector<64x64xbf16>
    %cst_47 = arith.constant dense<0.000000e+00> : vector<32x64xf32>
    %88 = tpu.matmul %85, %87, %cst_47 {dimension_numbers = #tpu.dot_dimension_numbers<[1], [0], [0], [1], [0, 0, 1, 1], [], []>} : vector<32x64xbf16>, vector<64x64xbf16>, vector<32x64xf32> -> vector<32x64xf32>
    %c3_48 = arith.constant 3 : index
    %c0_49 = arith.constant 0 : index
    %c0_50 = arith.constant 0 : index
    %89 = vector.load %arg7[%c3_48, %c0_49, %c0_50] : memref<4x1x64xf32, #tpu.memory_space<vmem>>, vector<1x1x64xf32>
    %90 = vector.shape_cast %89 : vector<1x1x64xf32> to vector<1x64xf32>
    %91 = vector.broadcast %90 : vector<1x64xf32> to vector<32x64xf32>
    %92 = arith.addf %88, %91 : vector<32x64xf32>
    %cst_51 = arith.constant 0.000000e+00 : f32
    %93 = vector.broadcast %cst_51 : f32 to vector<32x64xf32>
    %94 = arith.maximumf %92, %93 : vector<32x64xf32>
    %95 = arith.addf %94, %79 : vector<32x64xf32>
    %96 = vector.shape_cast %95 : vector<32x64xf32> to vector<2x16x64xf32>
    %cst_52 = arith.constant dense<0.000000e+00> : vector<2x64xf32>
    %97 = vector.multi_reduction <add>, %96, %cst_52 [1] : vector<2x16x64xf32> to vector<2x64xf32>
    %98 = arith.truncf %97 : vector<2x64xf32> to vector<2x64xbf16>
    %c0_53 = arith.constant 0 : index
    %c0_54 = arith.constant 0 : index
    %c0_55 = arith.constant 0 : index
    %99 = vector.load %arg8[%c0_53, %c0_54, %c0_55] : memref<2x64x64xbf16, #tpu.memory_space<vmem>>, vector<1x64x64xbf16>
    %100 = vector.shape_cast %99 : vector<1x64x64xbf16> to vector<64x64xbf16>
    %cst_56 = arith.constant dense<0.000000e+00> : vector<2x64xf32>
    %101 = tpu.matmul %98, %100, %cst_56 {dimension_numbers = #tpu.dot_dimension_numbers<[1], [0], [0], [1], [0, 0, 1, 1], [], []>} : vector<2x64xbf16>, vector<64x64xbf16>, vector<2x64xf32> -> vector<2x64xf32>
    %c0_57 = arith.constant 0 : index
    %c0_58 = arith.constant 0 : index
    %c0_59 = arith.constant 0 : index
    %102 = vector.load %arg9[%c0_57, %c0_58, %c0_59] : memref<2x1x64xf32, #tpu.memory_space<vmem>>, vector<1x1x64xf32>
    %103 = vector.shape_cast %102 : vector<1x1x64xf32> to vector<1x64xf32>
    %104 = vector.broadcast %103 : vector<1x64xf32> to vector<2x64xf32>
    %105 = arith.addf %101, %104 : vector<2x64xf32>
    %cst_60 = arith.constant 0.000000e+00 : f32
    %106 = vector.broadcast %cst_60 : f32 to vector<2x64xf32>
    %107 = arith.maximumf %105, %106 : vector<2x64xf32>
    %108 = arith.truncf %107 : vector<2x64xf32> to vector<2x64xbf16>
    %c1_61 = arith.constant 1 : index
    %c0_62 = arith.constant 0 : index
    %c0_63 = arith.constant 0 : index
    %109 = vector.load %arg8[%c1_61, %c0_62, %c0_63] : memref<2x64x64xbf16, #tpu.memory_space<vmem>>, vector<1x64x64xbf16>
    %110 = vector.shape_cast %109 : vector<1x64x64xbf16> to vector<64x64xbf16>
    %cst_64 = arith.constant dense<0.000000e+00> : vector<2x64xf32>
    %111 = tpu.matmul %108, %110, %cst_64 {dimension_numbers = #tpu.dot_dimension_numbers<[1], [0], [0], [1], [0, 0, 1, 1], [], []>} : vector<2x64xbf16>, vector<64x64xbf16>, vector<2x64xf32> -> vector<2x64xf32>
    %c1_65 = arith.constant 1 : index
    %c0_66 = arith.constant 0 : index
    %c0_67 = arith.constant 0 : index
    %112 = vector.load %arg9[%c1_65, %c0_66, %c0_67] : memref<2x1x64xf32, #tpu.memory_space<vmem>>, vector<1x1x64xf32>
    %113 = vector.shape_cast %112 : vector<1x1x64xf32> to vector<1x64xf32>
    %114 = vector.broadcast %113 : vector<1x64xf32> to vector<2x64xf32>
    %115 = arith.addf %111, %114 : vector<2x64xf32>
    %cst_68 = arith.constant 0.000000e+00 : f32
    %116 = vector.broadcast %cst_68 : f32 to vector<2x64xf32>
    %117 = arith.maximumf %115, %116 : vector<2x64xf32>
    %c0_69 = arith.constant 0 : index
    %c0_70 = arith.constant 0 : index
    %118 = vector.load %arg3[%c0_69, %c0_70] : memref<2x64xf32, #tpu.memory_space<vmem>>, vector<2x64xf32>
    %119 = tpu.concatenate %118, %117 in 1 : vector<2x64xf32>, vector<2x64xf32> -> vector<2x128xf32>
    %120 = arith.truncf %119 : vector<2x128xf32> to vector<2x128xbf16>
    %c0_71 = arith.constant 0 : index
    %c0_72 = arith.constant 0 : index
    %121 = vector.load %arg10[%c0_71, %c0_72] : memref<128x128xbf16, #tpu.memory_space<vmem>>, vector<128x128xbf16>
    %cst_73 = arith.constant dense<0.000000e+00> : vector<2x128xf32>
    %122 = tpu.matmul %120, %121, %cst_73 {dimension_numbers = #tpu.dot_dimension_numbers<[1], [0], [0], [1], [0, 0, 1, 1], [], []>} : vector<2x128xbf16>, vector<128x128xbf16>, vector<2x128xf32> -> vector<2x128xf32>
    %c0_74 = arith.constant 0 : index
    %c0_75 = arith.constant 0 : index
    %123 = vector.load %arg11[%c0_74, %c0_75] : memref<1x128xf32, #tpu.memory_space<vmem>>, vector<1x128xf32>
    %124 = vector.broadcast %123 : vector<1x128xf32> to vector<2x128xf32>
    %125 = arith.addf %122, %124 : vector<2x128xf32>
    %cst_76 = arith.constant 0.000000e+00 : f32
    %126 = vector.broadcast %cst_76 : f32 to vector<2x128xf32>
    %127 = arith.maximumf %125, %126 : vector<2x128xf32>
    %128 = arith.truncf %127 : vector<2x128xf32> to vector<2x128xbf16>
    %c0_77 = arith.constant 0 : index
    %c0_78 = arith.constant 0 : index
    %129 = vector.load %arg12[%c0_77, %c0_78] : memref<128x8xbf16, #tpu.memory_space<vmem>>, vector<128x8xbf16>
    %cst_79 = arith.constant dense<0.000000e+00> : vector<2x8xf32>
    %130 = tpu.matmul %128, %129, %cst_79 {dimension_numbers = #tpu.dot_dimension_numbers<[1], [0], [0], [1], [0, 0, 1, 1], [], []>} : vector<2x128xbf16>, vector<128x8xbf16>, vector<2x8xf32> -> vector<2x8xf32>
    %c0_80 = arith.constant 0 : index
    %c0_81 = arith.constant 0 : index
    %131 = vector.load %arg13[%c0_80, %c0_81] : memref<1x8xf32, #tpu.memory_space<vmem>>, vector<1x8xf32>
    %132 = vector.broadcast %131 : vector<1x8xf32> to vector<2x8xf32>
    %133 = arith.addf %130, %132 : vector<2x8xf32>
    %cst_82 = arith.constant 0.000000e+00 : f32
    %134 = vector.broadcast %cst_82 : f32 to vector<2x120xf32>
    %135 = tpu.concatenate %133, %134 in 1 : vector<2x8xf32>, vector<2x120xf32> -> vector<2x128xf32>
    %c0_83 = arith.constant 0 : index
    %c0_84 = arith.constant 0 : index
    %136 = vector.load %arg14[%c0_83, %c0_84] : memref<2x128xf32, #tpu.memory_space<vmem>>, vector<2x128xf32>
    tpu.vector_store %arg14[%c0_83, %c0_84], %135 {strides = array<i32>} : memref<2x128xf32, #tpu.memory_space<vmem>>, vector<2x128xf32>,
    return
  }
  func.func @transform_0(%arg0: i32) -> (i32, i32, i32) {
    %c0_i32 = arith.constant 0 : i32
    %c0_i32_0 = arith.constant 0 : i32
    %c0_i32_1 = arith.constant 0 : i32
    return %arg0, %c0_i32, %c0_i32_0 : i32, i32, i32
  }
  func.func @transform_1(%arg0: i32) -> (i32, i32, i32) {
    %c0_i32 = arith.constant 0 : i32
    %c0_i32_0 = arith.constant 0 : i32
    %c0_i32_1 = arith.constant 0 : i32
    return %arg0, %c0_i32, %c0_i32_0 : i32, i32, i32
  }
  func.func @transform_2(%arg0: i32) -> (i32, i32) {
    %c0_i32 = arith.constant 0 : i32
    %c0_i32_0 = arith.constant 0 : i32
    return %arg0, %c0_i32 : i32, i32
  }
  func.func @transform_3(%arg0: i32) -> (i32, i32) {
    %c0_i32 = arith.constant 0 : i32
    %c0_i32_0 = arith.constant 0 : i32
    %c0_i32_1 = arith.constant 0 : i32
    return %c0_i32, %c0_i32_0 : i32, i32
  }
  func.func @transform_4(%arg0: i32) -> (i32, i32) {
    %c0_i32 = arith.constant 0 : i32
    %c0_i32_0 = arith.constant 0 : i32
    %c0_i32_1 = arith.constant 0 : i32
    return %c0_i32, %c0_i32_0 : i32, i32
  }
  func.func @transform_5(%arg0: i32) -> (i32, i32, i32) {
    %c0_i32 = arith.constant 0 : i32
    %c0_i32_0 = arith.constant 0 : i32
    %c0_i32_1 = arith.constant 0 : i32
    %c0_i32_2 = arith.constant 0 : i32
    return %c0_i32, %c0_i32_0, %c0_i32_1 : i32, i32, i32
  }
  func.func @transform_6(%arg0: i32) -> (i32, i32, i32) {
    %c0_i32 = arith.constant 0 : i32
    %c0_i32_0 = arith.constant 0 : i32
    %c0_i32_1 = arith.constant 0 : i32
    %c0_i32_2 = arith.constant 0 : i32
    return %c0_i32, %c0_i32_0, %c0_i32_1 : i32, i32, i32
  }
  func.func @transform_7(%arg0: i32) -> (i32, i32, i32) {
    %c0_i32 = arith.constant 0 : i32
    %c0_i32_0 = arith.constant 0 : i32
    %c0_i32_1 = arith.constant 0 : i32
    %c0_i32_2 = arith.constant 0 : i32
    return %c0_i32, %c0_i32_0, %c0_i32_1 : i32, i32, i32
  }
  func.func @transform_8(%arg0: i32) -> (i32, i32, i32) {
    %c0_i32 = arith.constant 0 : i32
    %c0_i32_0 = arith.constant 0 : i32
    %c0_i32_1 = arith.constant 0 : i32
    %c0_i32_2 = arith.constant 0 : i32
    return %c0_i32, %c0_i32_0, %c0_i32_1 : i32, i32, i32
  }
  func.func @transform_9(%arg0: i32) -> (i32, i32) {
    %c0_i32 = arith.constant 0 : i32
    %c0_i32_0 = arith.constant 0 : i32
    %c0_i32_1 = arith.constant 0 : i32
    return %c0_i32, %c0_i32_0 : i32, i32
  }
  func.func @transform_10(%arg0: i32) -> (i32, i32) {
    %c0_i32 = arith.constant 0 : i32
    %c0_i32_0 = arith.constant 0 : i32
    %c0_i32_1 = arith.constant 0 : i32
    return %c0_i32, %c0_i32_0 : i32, i32
  }
  func.func @transform_11(%arg0: i32) -> (i32, i32) {
    %c0_i32 = arith.constant 0 : i32
    %c0_i32_0 = arith.constant 0 : i32
    %c0_i32_1 = arith.constant 0 : i32
    return %c0_i32, %c0_i32_0 : i32, i32
  }
  func.func @transform_12(%arg0: i32) -> (i32, i32) {
    %c0_i32 = arith.constant 0 : i32
    %c0_i32_0 = arith.constant 0 : i32
    %c0_i32_1 = arith.constant 0 : i32
    return %c0_i32, %c0_i32_0 : i32, i32
  }
  func.func @transform_13(%arg0: i32) -> (i32, i32) {
    %c0_i32 = arith.constant 0 : i32
    %c0_i32_0 = arith.constant 0 : i32
    return %arg0, %c0_i32 : i32, i32
  }
}

</mosaic_0001>

<bundles_post_ra>
// kernel: solvent_layer_forward.1
= control target key start
LH: loop header
LB: loop body
LE: loop exit
PB: predicated region body
PF: predicated region fallthrough
CT: control target
= control target key end

     0   :  { %vm54_vm0 = vcmask 130048   ;;  %vm136_vm1 = vcmask 261120   ;;  %s2132_s0 = inlined_call_operand.vmem [shape: bf16[2,16,16], index: 0, kind: input, shape index: {}]   ;;  %s2133_s1 = inlined_call_operand.vmem [shape: f32[2,16,32], index: 1, kind: input, shape index: {}]   ;;  %s2134_s2 = inlined_call_operand.vmem [shape: f32[2,64], index: 2, kind: input, shape index: {}]   ;;  %s2135_s3 = inlined_call_operand.vmem [shape: bf16[32,64], index: 3, kind: input, shape index: {}]   ;;  %s2136_s4 = inlined_call_operand.vmem [shape: f32[1,64], index: 4, kind: input, shape index: {}]   ;;  %s2137_s5 = inlined_call_operand.vmem [shape: bf16[4,64,64], index: 5, kind: input, shape index: {}]   ;;  %s2138_s6 = inlined_call_operand.vmem [shape: f32[4,1,64], index: 6, kind: input, shape index: {}]   ;;  %s2139_s7 = inlined_call_operand.vmem [shape: bf16[2,64,64], index: 7, kind: input, shape index: {}]   ;;  %s2140_s8 = inlined_call_operand.vmem [shape: f32[2,1,64], index: 8, kind: input, shape index: {}]   ;;  %s2141_s9 = inlined_call_operand.vmem [shape: bf16[128,128], index: 9, kind: input, shape index: {}]   ;;  %s2142_s10 = inlined_call_operand.vmem [shape: f32[1,128], index: 10, kind: input, shape index: {}]   ;;  %s2143_s11 = inlined_call_operand.vmem [shape: bf16[128,8], index: 11, kind: input, shape index: {}]   ;;  %s2144_s12 = inlined_call_operand.vmem [shape: f32[1,8], index: 12, kind: input, shape index: {}]   ;;  %s2145_s13 = inlined_call_operand.hbm [shape: f32[2,128], index: 13, kind: output, shape index: {}]  }
   0x1   :  { %v1670_v0 = vld [vmem:[%s2135_s3] sm:$0xff]   ;;  %v1439_v1 = vld [vmem:[%s2132_s0 + $0x8] sm:$0xff]   ;;  %v150_v8 = vld [vmem:[%s2133_s1 + $0x10] sm:$0xff] }
   0x2   :  { %1512 = vmatprep.subr.bf16.mxu0 %v1670_v0  ;;  %v1437_v2 = vunpack.c.l.bf16 %v1439_v1  ;;  %v1671_v3 = vld [vmem:[%s2135_s3 + $0x8] sm:$0xff]   ;;  %v1438_v4 = vunpack.c.h.bf16 %v1439_v1  ;;  %v148_v5 = vld [vmem:[%s2133_s1] sm:$0xff]  ;;  %v151_v9 = vld [vmem:[%s2133_s1 + $0x18] sm:$0xff] }
   0x3   :  { %v149_v6 = vld [vmem:[%s2133_s1 + $0x8] sm:$0xff]  ;;  %1513 = vmatpush3.bf16.msra.mxu0 %v1670_v0  ;;  %v1432_v10 = vld [vmem:[%s2132_s0] sm:$0xff]   ;;  %v153_v15 = vpack.c.bf16 %v151_v9, %v150_v8 }
   0x4   :  { %v152_v7 = vpack.c.bf16 %v149_v6, %v148_v5  ;;  %v61_v11 = vsel %vm54_vm0, %v1437_v2, 0.0  ;;  %1514 = vmatprep.subr.bf16.mxu0 %v1671_v3  ;;  %v1433_v12 = vunpack.c.l.bf16 %v1432_v10  ;;  %v1434_v13 = vunpack.c.h.bf16 %v1432_v10 }
   0x5   :  { %62 = vadd.xlane.f32.xlu0 %v61_v11  ;;  %v64_v14 = vsel %vm54_vm0, %v1438_v4, 0.0 }
   0x6   :  { %1516 = vmatprep.mubr.msk.bf16.mxu0 %vm136_vm1, %v152_v7  ;;  %v55_v16 = vsel %vm54_vm0, %v1433_v12, 0.0  ;;  %v58_v17 = vsel %vm54_vm0, %v1434_v13, 0.0 }
   0x7   :  { %1515 = vmatpush3.bf16.msra.mxu0 %v1671_v3  ;;  %56 = vadd.xlane.f32.xlu1 %v55_v16 }
   0x9   :  { %65 = vadd.xlane.f32.xlu0 %v64_v14 }
   0xa   :  { %1517 = vmatmul.mubr.msk.bf16.vlgmr.msra.gmra.mrb[0].mxu0 %vm136_vm1, %v153_v15 }
   0xb   :  { %59 = vadd.xlane.f32.xlu1 %v58_v17 }
   0xc   :  { %18 = vsyncpa [#allocation4], 0  ;;  %v1744_v18 = vmov 0   ;;  %v83_v24 = vlaneseq  ;;  %vm94_vm2 = vcmask 130112   ;;  %v1672_v48 = vld [vmem:[%s2137_s5] sm:$0xff]   ;;  %v1673_v49 = vld [vmem:[%s2137_s5 + $0x8] sm:$0xff]  }
   0xd   :  { %137 = vst.msk [vmem:[#allocation2] sm:$0xff] %vm136_vm1, %v1744_v18  ;;  %138 = vst.msk [vmem:[#allocation2 + $0x8] sm:$0xff] %vm136_vm1, %v1744_v18  ;;  %1528 = vmatprep.subr.bf16.mxu0 %v1672_v48  ;;  %s1745_s25 = smov 16   ;;  %v1324_v57 = vld [vmem:[%s2136_s4] ss:$0 sm:$0xff]  ;;  %vm144_vm3 = vcmask 261248  }
   0xe   :  { %v84_v28 = vand.u32 127, %v83_v24  ;;  %v86_v29 = vshrl.u32 %v83_v24, 7  ;;  %1529 = vmatpush3.bf16.msra.mxu0 %v1672_v48  ;;  %v1674_v5 = vld [vmem:[%s2137_s5 + $0x10] sm:$0xff]   ;;  %v1675_v6 = vld [vmem:[%s2137_s5 + $0x18] sm:$0xff]   ;;  %vm334_vm4 = vcmask 523264   ;;  %vm1747_vm5 = vmmov 0  }
   0xf   :  { %1530 = vmatprep.subr.bf16.mxu0 %v1673_v49  ;;  %vm105_vm6 = vcmask 1041409   ;;  %s1748_s19 = smov 64   ;;  %s1749_s28 = smov [#allocation3]   ;;  %vm1307_vm7 = vcmask 64512  }
  0x10   :  { %v89_v30 = vadd.s32 4294967288, %v84_v28  ;;  %v87_v32 = vsub.s32 %v84_v28, %v86_v29  ;;  %s1316_s29 = sshll.u32 %s1749_s28, 4  ;;  %s1317_s29 = int_to_ptr.vmem [resolvable:$true] %s1316_s29 }
  0x11   :  { %p1725_p1 = scmp.lt.s32.totalorder %s1317_s29, %s1317_s29 }
  0x12   :  { %v92_v33 = vsub.s32 %v89_v30, %v86_v29  ;;  %1531 = vmatpush3.bf16.msra.mxu0 %v1673_v49 }
  0x13   :  { %1532 = vmatprep.subr.bf16.mxu0 %v1674_v5 }
  0x16   :  { %1533 = vmatpush3.bf16.msra.mxu0 %v1674_v5 }
  0x17   :  { %1534 = vmatprep.subr.bf16.mxu0 %v1675_v6 }
  0x1a   :  { %1535 = vmatpush3.bf16.msra.mxu0 %v1675_v6 }
  0x92   :  { %v63_v19 = vpop.xlane.xlu0 %62 }
  0x93   :  { %v69_v20 = vadd.f32 1.0, %v63_v19 }
  0x94   :  { %v57_v21 = vpop.xlane.xlu1 %56 }
  0x95   :  { %v67_v22 = vadd.f32 1.0, %v57_v21  ;;  %1712 = vrsqrt.f32 %v69_v20 }
  0x96   :  { %v66_v23 = vpop.xlane.xlu0 %65 }
  0x97   :  { %v70_v25 = vadd.f32 1.0, %v66_v23  ;;  %1714 = vrsqrt.f32 %v67_v22 }
  0x98   :  { %v60_v26 = vpop.xlane.xlu1 %59 }
  0x99   :  { %1716 = vrsqrt.f32 %v70_v25  ;;  %v68_v27 = vadd.f32 1.0, %v60_v26  ;;  %v1331_v25 = vld [vmem:[%s2138_s6] ss:$0 sm:$0xff] }
  0x9b   :  { %1718 = vrsqrt.f32 %v68_v27 }
  0x9f   :  { %v1852_v31 = vpop.eup %1712 }
  0xa0   :  { %v99_v37 = vrot.slane %v1852_v31, %v87_v32  ;;  %v77_v41 = vmul.f32 %v1852_v31, %v1437_v2  ;;  %v1888_v9 = vmul.f32 %v1852_v31, %v1852_v31 }
  0xa1   :  { %v1715_v34 = vpop.eup %1714 }
  0xa2   :  { %v88_v39 = vrot.slane %v1715_v34, %v87_v32  ;;  %v75_v42 = vmul.f32 %v1715_v34, %v1433_v12  ;;  %v1882_v7 = vmul.f32 %v1715_v34, %v1715_v34 }
  0xa3   :  { %v1717_v35 = vpop.eup %1716 }
  0xa4   :  { %v78_v36 = vmul.f32 %v1717_v35, %v1438_v4  ;;  %v103_v38 = vrot.slane %v1717_v35, %v92_v33  ;;  %v1890_v10 = vmul.f32 %v1717_v35, %v1717_v35 }
  0xa5   :  { %v1719_v40 = vpop.eup %1718 }
  0xa6   :  { %v104_v43 = vsel %vm94_vm2, %v103_v38, %v99_v37  ;;  %v76_v44 = vmul.f32 %v1719_v40, %v1434_v13  ;;  %v93_v45 = vrot.slane %v1719_v40, %v92_v33  ;;  %v1884_v8 = vmul.f32 %v1719_v40, %v1719_v40 }
  0xa7   :  { %v128_v46 = vmul.f32 %v104_v43, %v77_v41  ;;  %v129_v47 = vmul.f32 %v104_v43, %v78_v36 }
  0xa8   :  { %v95_v50 = vsel %vm94_vm2, %v93_v45, %v88_v39  ;;  %v1677_v45 = vld [vmem:[%s2137_s5 + $0x28] sm:$0xff]  }
  0xa9   :  { %v131_v51 = vpack.c.bf16 %v129_v47, %v128_v46  ;;  %v126_v52 = vmul.f32 %v95_v50, %v75_v42  ;;  %v127_v53 = vmul.f32 %v95_v50, %v76_v44  ;;  %v1676_v44 = vld [vmem:[%s2137_s5 + $0x20] sm:$0xff]   ;;  %v1678_v46 = vld [vmem:[%s2137_s5 + $0x30] sm:$0xff]   ;;  %v1679_v47 = vld [vmem:[%s2137_s5 + $0x38] sm:$0xff]  }
  0xab   :  { %141 = vrot.lane.b32.xlu0 %v131_v51, %s1745_s25  ;;  %v130_v54 = vpack.c.bf16 %v127_v53, %v126_v52 }
  0xad   :  { %139 = vst.msk [vmem:[#allocation2] sm:$0xff] %vm54_vm0, %v130_v54 }
  0xb4   :  { %v1863_v55 = vld [vmem:[#allocation2] sm:$0xff] }
  0xb5   :  { %1524 = vmatprep.mubr.msk.bf16.mxu1 %vm136_vm1, %v1863_v55 }
  0xdd   :  { %v1518_v56 = vpop.f32.mrb[0].mxu0 }
  0xde   :  { %v217_v58 = vpop.f32.mrb[1].mxu0  ;;  %v226_v62 = vadd.f32 %v1518_v56, %v1324_v57 }
  0xdf   :  { %v218_v59 = vadd.f32 %v1324_v57, %v217_v58  ;;  %v1519_v60 = vpop.f32.mrb[2].mxu0 }
  0xe0   :  { %v220_v61 = vpop.f32.mrb[3].mxu0  ;;  %v229_v63 = vadd.f32 %v1519_v60, %v1324_v57  ;;  %v236_v12 = vmul.f32 %v226_v62, %v1888_v9 }
  0xe1   :  { %v221_v0 = vadd.f32 %v1324_v57, %v220_v61  ;;  %v234_v15 = vmul.f32 %v218_v59, %v1882_v7 }
  0xe2   :  { %v233_v2 = vpack.c.bf16 %v229_v63, %v226_v62  ;;  %v237_v14 = vmul.f32 %v229_v63, %v1890_v10 }
  0xe3   :  { %v232_v1 = vpack.c.bf16 %v221_v0, %v218_v59  ;;  %v235_v17 = vmul.f32 %v221_v0, %v1884_v8 }
  0xe5   :  { %1520 = vmatprep.subr.bf16.mxu1 %v232_v1 }
  0xe6   :  { %1521 = vmatpush3.bf16.msra.mxu1 %v232_v1 }
  0xe7   :  { %1522 = vmatprep.subr.bf16.mxu1 %v233_v2 }
  0xea   :  { %1523 = vmatpush3.bf16.msra.mxu1 %v233_v2 }
 0x11d   :  { %v142_v3 = vpop.permute.xlu0 %141 }
 0x11e   :  { %145 = vst.msk [vmem:[#allocation2 + $0x8] sm:$0xff] %vm144_vm3, %v142_v3 }
 0x125   :  { %v1870_v4 = vld [vmem:[#allocation2 + $0x8] sm:$0xff] }
 0x126   :  { %1525 = vmatmul.mubr.msk.bf16.vlgmr.msra.gmra.mrb[0].mxu1 %vm136_vm1, %v1870_v4 }
 0x127   :  { %1544 = vmatprep.mubr.msk.bf16.mxu1 %vm136_vm1, %v1863_v55 }
 0x1f9   :  { %v1526_v11 = vpop.f32.mrb[0].mxu1 }
 0x1fa   :  { %v278_v13 = vpop.f32.mrb[1].mxu1  ;;  %v287_v18 = vadd.f32 %v1526_v11, %v236_v12 }
 0x1fb   :  { %v1527_v16 = vpop.f32.mrb[2].mxu1  ;;  %v279_v21 = vadd.f32 %v278_v13, %v234_v15 }
 0x1fc   :  { %v290_v19 = vadd.f32 %v1527_v16, %v237_v14  ;;  %v281_v20 = vpop.f32.mrb[3].mxu1 }
 0x1fd   :  { %v282_v22 = vadd.f32 %v281_v20, %v235_v17 }
 0x1fe   :  { %v294_v23 = vpack.c.bf16 %v290_v19, %v287_v18 }
 0x1ff   :  { %v293_v24 = vpack.c.bf16 %v282_v22, %v279_v21  ;;  %v1680_v22 = vld [vmem:[%s2137_s5 + $0x40] sm:$0xff]  }
 0x201   :  { %1536 = vmatprep.mubr.msk.bf16.mxu0 %vm334_vm4, %v293_v24  ;;  %v1682_v24 = vld [vmem:[%s2137_s5 + $0x50] sm:$0xff]  }
 0x202   :  { %1537 = vmatmul.mubr.msk.bf16.vlgmr.msra.gmra.mrb[4].mxu0 %vm334_vm4, %v294_v23  ;;  %v1681_v23 = vld [vmem:[%s2137_s5 + $0x48] sm:$0xff]  }
 0x203   :  { %1564 = vmatprep.mubr.msk.bf16.mxu0 %vm136_vm1, %v1863_v55 }
 0x2d5   :  { %v1538_v26 = vpop.f32.mrb[4].mxu0 }
 0x2d6   :  { %v375_v27 = vpop.f32.mrb[5].mxu0  ;;  %v384_v28 = vadd.f32 %v1538_v26, %v1331_v25 }
 0x2d7   :  { %v376_v29 = vadd.f32 %v1331_v25, %v375_v27  ;;  %v1539_v30 = vpop.f32.mrb[6].mxu0 }
 0x2d8   :  { %v387_v31 = vadd.f32 %v1539_v30, %v1331_v25  ;;  %v378_v32 = vpop.f32.mrb[7].mxu0  ;;  %v392_v36 = vmax.f32 %v384_v28, 0.0 }
 0x2d9   :  { %v390_v33 = vmax.f32 %v376_v29, 0.0  ;;  %v379_v34 = vadd.f32 %v1331_v25, %v378_v32  ;;  %v1683_v25 = vld [vmem:[%s2137_s5 + $0x58] sm:$0xff]  }
 0x2da   :  { %v393_v35 = vmax.f32 %v387_v31, 0.0  ;;  %v396_v41 = vadd.f32 %v392_v36, %v226_v62 }
 0x2db   :  { %v391_v37 = vmax.f32 %v379_v34, 0.0  ;;  %v394_v38 = vadd.f32 %v390_v33, %v218_v59 }
 0x2dc   :  { %v397_v39 = vadd.f32 %v393_v35, %v229_v63  ;;  %v402_v49 = vmul.f32 %v396_v41, %v1888_v9  ;;  %v1349_v63 = vld [vmem:[%s2138_s6 + $0x1] ss:$0 sm:$0xff] }
 0x2dd   :  { %v395_v40 = vadd.f32 %v391_v37, %v221_v0  ;;  %v400_v52 = vmul.f32 %v394_v38, %v1882_v7 }
 0x2de   :  { %v399_v43 = vpack.c.bf16 %v397_v39, %v396_v41  ;;  %v403_v51 = vmul.f32 %v397_v39, %v1890_v10 }
 0x2df   :  { %v398_v42 = vpack.c.bf16 %v395_v40, %v394_v38  ;;  %v401_v54 = vmul.f32 %v395_v40, %v1884_v8 }
 0x2e1   :  { %1540 = vmatprep.subr.bf16.mxu1 %v398_v42 }
 0x2e2   :  { %1541 = vmatpush3.bf16.msra.mxu1 %v398_v42 }
 0x2e3   :  { %1542 = vmatprep.subr.bf16.mxu1 %v399_v43 }
 0x2e6   :  { %1543 = vmatpush3.bf16.msra.mxu1 %v399_v43 }
 0x2e7   :  { %1548 = vmatprep.subr.bf16.mxu1 %v1676_v44 }
 0x2e9   :  { %1545 = vmatmul.mubr.msk.bf16.vlgmr.msra.gmra.mrb[4].mxu1 %vm136_vm1, %v1870_v4 }
 0x2ea   :  { %1549 = vmatpush3.bf16.msra.mxu1 %v1676_v44 }
 0x2eb   :  { %1550 = vmatprep.subr.bf16.mxu1 %v1677_v45 }
 0x2ee   :  { %1551 = vmatpush3.bf16.msra.mxu1 %v1677_v45 }
 0x2ef   :  { %1552 = vmatprep.subr.bf16.mxu1 %v1678_v46 }
 0x2f2   :  { %1553 = vmatpush3.bf16.msra.mxu1 %v1678_v46 }
 0x2f3   :  { %1554 = vmatprep.subr.bf16.mxu1 %v1679_v47 }
 0x2f6   :  { %1555 = vmatpush3.bf16.msra.mxu1 %v1679_v47 }
 0x3bc   :  { %v1546_v48 = vpop.f32.mrb[4].mxu1 }
 0x3bd   :  { %v438_v50 = vpop.f32.mrb[5].mxu1  ;;  %v447_v56 = vadd.f32 %v1546_v48, %v402_v49 }
 0x3be   :  { %v1547_v53 = vpop.f32.mrb[6].mxu1  ;;  %v439_v59 = vadd.f32 %v438_v50, %v400_v52 }
 0x3bf   :  { %v450_v57 = vadd.f32 %v1547_v53, %v403_v51  ;;  %v441_v58 = vpop.f32.mrb[7].mxu1 }
 0x3c0   :  { %v442_v60 = vadd.f32 %v441_v58, %v401_v54 }
 0x3c1   :  { %v454_v61 = vpack.c.bf16 %v450_v57, %v447_v56 }
 0x3c2   :  { %v453_v62 = vpack.c.bf16 %v442_v60, %v439_v59  ;;  %v1684_v60 = vld [vmem:[%s2137_s5 + $0x60] sm:$0xff]  }
 0x3c4   :  { %1556 = vmatprep.mubr.msk.bf16.mxu1 %vm334_vm4, %v453_v62  ;;  %v1686_v62 = vld [vmem:[%s2137_s5 + $0x70] sm:$0xff]  }
 0x3c5   :  { %1557 = vmatmul.mubr.msk.bf16.vlgmr.msra.gmra.mrb[8].mxu1 %vm334_vm4, %v454_v61  ;;  %v1685_v61 = vld [vmem:[%s2137_s5 + $0x68] sm:$0xff]  }
 0x3c6   :  { %1584 = vmatprep.mubr.msk.bf16.mxu1 %vm136_vm1, %v1863_v55 }
 0x498   :  { %v1558_v0 = vpop.f32.mrb[8].mxu1 }
 0x499   :  { %v536_v1 = vpop.f32.mrb[9].mxu1  ;;  %v545_v2 = vadd.f32 %v1558_v0, %v1349_v63 }
 0x49a   :  { %v537_v3 = vadd.f32 %v1349_v63, %v536_v1  ;;  %v1559_v5 = vpop.f32.mrb[10].mxu1 }
 0x49b   :  { %v548_v6 = vadd.f32 %v1559_v5, %v1349_v63  ;;  %v539_v11 = vpop.f32.mrb[11].mxu1  ;;  %v553_v15 = vmax.f32 %v545_v2, 0.0 }
 0x49c   :  { %v551_v12 = vmax.f32 %v537_v3, 0.0  ;;  %v540_v13 = vadd.f32 %v1349_v63, %v539_v11  ;;  %v1687_v63 = vld [vmem:[%s2137_s5 + $0x78] sm:$0xff]  }
 0x49d   :  { %v554_v14 = vmax.f32 %v548_v6, 0.0  ;;  %v557_v55 = vadd.f32 %v553_v15, %v396_v41 }
 0x49e   :  { %v552_v16 = vmax.f32 %v540_v13, 0.0  ;;  %v555_v17 = vadd.f32 %v551_v12, %v394_v38 }
 0x49f   :  { %v558_v18 = vadd.f32 %v554_v14, %v397_v39  ;;  %v563_v27 = vmul.f32 %v557_v55, %v1888_v9 }
 0x4a0   :  { %v556_v19 = vadd.f32 %v552_v16, %v395_v40  ;;  %v561_v30 = vmul.f32 %v555_v17, %v1882_v7  ;;  %v1367_v40 = vld [vmem:[%s2138_s6 + $0x2] ss:$0 sm:$0xff] }
 0x4a1   :  { %v560_v21 = vpack.c.bf16 %v558_v18, %v557_v55  ;;  %v564_v29 = vmul.f32 %v558_v18, %v1890_v10 }
 0x4a2   :  { %v559_v20 = vpack.c.bf16 %v556_v19, %v555_v17  ;;  %v562_v32 = vmul.f32 %v556_v19, %v1884_v8 }
 0x4a4   :  { %1560 = vmatprep.subr.bf16.mxu0 %v559_v20 }
 0x4a5   :  { %1561 = vmatpush3.bf16.msra.mxu0 %v559_v20  ;;  %v1385_v20 = vld [vmem:[%s2138_s6 + $0x3] ss:$0 sm:$0xff] }
 0x4a6   :  { %1562 = vmatprep.subr.bf16.mxu0 %v560_v21 }
 0x4a9   :  { %1563 = vmatpush3.bf16.msra.mxu0 %v560_v21 }
 0x4aa   :  { %1568 = vmatprep.subr.bf16.mxu0 %v1680_v22 }
 0x4ac   :  { %1565 = vmatmul.mubr.msk.bf16.vlgmr.msra.gmra.mrb[8].mxu0 %vm136_vm1, %v1870_v4 }
 0x4ad   :  { %1569 = vmatpush3.bf16.msra.mxu0 %v1680_v22 }
 0x4ae   :  { %1570 = vmatprep.subr.bf16.mxu0 %v1681_v23 }
 0x4b1   :  { %1571 = vmatpush3.bf16.msra.mxu0 %v1681_v23 }
 0x4b2   :  { %1572 = vmatprep.subr.bf16.mxu0 %v1682_v24 }
 0x4b5   :  { %1573 = vmatpush3.bf16.msra.mxu0 %v1682_v24 }
 0x4b6   :  { %1574 = vmatprep.subr.bf16.mxu0 %v1683_v25 }
 0x4b9   :  { %1575 = vmatpush3.bf16.msra.mxu0 %v1683_v25 }
 0x57f   :  { %v1566_v26 = vpop.f32.mrb[8].mxu0 }
 0x580   :  { %v599_v28 = vpop.f32.mrb[9].mxu0  ;;  %v608_v33 = vadd.f32 %v1566_v26, %v563_v27 }
 0x581   :  { %v1567_v31 = vpop.f32.mrb[10].mxu0  ;;  %v600_v36 = vadd.f32 %v599_v28, %v561_v30 }
 0x582   :  { %v611_v34 = vadd.f32 %v1567_v31, %v564_v29  ;;  %v602_v35 = vpop.f32.mrb[11].mxu0 }
 0x583   :  { %v603_v37 = vadd.f32 %v602_v35, %v562_v32 }
 0x584   :  { %v615_v38 = vpack.c.bf16 %v611_v34, %v608_v33 }
 0x585   :  { %v614_v39 = vpack.c.bf16 %v603_v37, %v600_v36 }
 0x587   :  { %1576 = vmatprep.mubr.msk.bf16.mxu0 %vm334_vm4, %v614_v39 }
 0x588   :  { %1577 = vmatmul.mubr.msk.bf16.vlgmr.msra.gmra.mrb[12].mxu0 %vm334_vm4, %v615_v38 }
 0x65b   :  { %v1578_v41 = vpop.f32.mrb[12].mxu0 }
 0x65c   :  { %v697_v42 = vpop.f32.mrb[13].mxu0  ;;  %v706_v43 = vadd.f32 %v1578_v41, %v1367_v40 }
 0x65d   :  { %v698_v44 = vadd.f32 %v1367_v40, %v697_v42  ;;  %v1579_v45 = vpop.f32.mrb[14].mxu0 }
 0x65e   :  { %v709_v46 = vadd.f32 %v1579_v45, %v1367_v40  ;;  %v700_v47 = vpop.f32.mrb[15].mxu0  ;;  %v714_v51 = vmax.f32 %v706_v43, 0.0 }
 0x65f   :  { %v712_v48 = vmax.f32 %v698_v44, 0.0  ;;  %v701_v49 = vadd.f32 %v1367_v40, %v700_v47 }
 0x660   :  { %v715_v50 = vmax.f32 %v709_v46, 0.0  ;;  %v1957_v57 = vadd.f32 %v714_v51, %v557_v55  ;;  %v1693_v55 = vld [vmem:[%s2139_s7 + $0x28] sm:$0xff]  }
 0x661   :  { %v713_v52 = vmax.f32 %v701_v49, 0.0  ;;  %v1951_v53 = vadd.f32 %v712_v48, %v555_v17 }
 0x662   :  { %v1953_v54 = vadd.f32 %v715_v50, %v558_v18  ;;  %v724_v1 = vmul.f32 %v1957_v57, %v1888_v9  ;;  %v1688_v9 = vld [vmem:[%s2139_s7] sm:$0xff]   ;;  %v1691_v18 = vld [vmem:[%s2139_s7 + $0x18] sm:$0xff]  }
 0x663   :  { %v1955_v56 = vadd.f32 %v713_v52, %v556_v19  ;;  %v722_v3 = vmul.f32 %v1951_v53, %v1882_v7  ;;  %v1746_v7 = vmov 0.0   ;;  %v1692_v19 = vld [vmem:[%s2139_s7 + $0x20] sm:$0xff]  }
 0x664   :  { %v721_v59 = vpack.c.bf16 %v1953_v54, %v1957_v57  ;;  %v725_v2 = vmul.f32 %v1953_v54, %v1890_v10  ;;  %1600 = vmatprep.subr.bf16.mxu0 %v1746_v7  ;;  %v1690_v10 = vld [vmem:[%s2139_s7 + $0x10] sm:$0xff]   ;;  %1608 = vmatprep.mubr.msk.bf16.mxu0 %vm1747_vm5, %v1746_v7 }
 0x665   :  { %v720_v58 = vpack.c.bf16 %v1955_v56, %v1951_v53  ;;  %v723_v6 = vmul.f32 %v1955_v56, %v1884_v8  ;;  %1601 = vmatpush3.bf16.msra.mxu0 %v1688_v9  ;;  %v1689_v8 = vld [vmem:[%s2139_s7 + $0x8] sm:$0xff]   ;;  %v1702_v9 = vld [vmem:[%s2141_s9 + $0x30] sm:$0xff]  }
 0x666   :  { %1602 = vmatprep.subr.bf16.mxu0 %v1746_v7 }
 0x667   :  { %1580 = vmatprep.subr.bf16.mxu1 %v720_v58 }
 0x668   :  { %1581 = vmatpush3.bf16.msra.mxu1 %v720_v58 }
 0x669   :  { %1582 = vmatprep.subr.bf16.mxu1 %v721_v59  ;;  %1603 = vmatpush3.bf16.msra.mxu0 %v1689_v8  ;;  %v1703_v8 = vld [vmem:[%s2141_s9 + $0x38] sm:$0xff]  }
 0x66a   :  { %1604 = vmatprep.subr.bf16.mxu0 %v1746_v7 }
 0x66c   :  { %1583 = vmatpush3.bf16.msra.mxu1 %v721_v59 }
 0x66d   :  { %1588 = vmatprep.subr.bf16.mxu1 %v1684_v60  ;;  %1605 = vmatpush3.bf16.msra.mxu0 %v1690_v10  ;;  %v1704_v10 = vld [vmem:[%s2143_s11] sm:$0xff]  }
 0x66e   :  { %1606 = vmatprep.subr.bf16.mxu0 %v1746_v7 }
 0x66f   :  { %1585 = vmatmul.mubr.msk.bf16.vlgmr.msra.gmra.mrb[12].mxu1 %vm136_vm1, %v1870_v4 }
 0x670   :  { %1589 = vmatpush3.bf16.msra.mxu1 %v1684_v60 }
 0x671   :  { %1590 = vmatprep.subr.bf16.mxu1 %v1685_v61  ;;  %1607 = vmatpush3.bf16.msra.mxu0 %v1691_v18  ;;  %v1705_v18 = vld [vmem:[%s2143_s11 + $0x8] sm:$0xff]  }
 0x672   :  { %1624 = vmatprep.subr.bf16.mxu0 %v1746_v7 }
 0x674   :  { %1591 = vmatpush3.bf16.msra.mxu1 %v1685_v61 }
 0x675   :  { %1592 = vmatprep.subr.bf16.mxu1 %v1686_v62 }
 0x678   :  { %1593 = vmatpush3.bf16.msra.mxu1 %v1686_v62  ;;  %v1694_v62 = vld [vmem:[%s2139_s7 + $0x30] sm:$0xff]  }
 0x679   :  { %1594 = vmatprep.subr.bf16.mxu1 %v1687_v63 }
 0x67c   :  { %1595 = vmatpush3.bf16.msra.mxu1 %v1687_v63  ;;  %v1695_v63 = vld [vmem:[%s2139_s7 + $0x38] sm:$0xff]  }
 0x67d   :  { %1612 = vmatprep.subr.bf16.mxu1 %v1746_v7 }
 0x742   :  { %v1586_v0 = vpop.f32.mrb[12].mxu1 }
 0x743   :  { %v760_v4 = vpop.f32.mrb[13].mxu1  ;;  %v769_v11 = vadd.f32 %v1586_v0, %v724_v1  ;;  %v1392_v0 = vld [vmem:[%s2140_s8] ss:$0 sm:$0xff] }
 0x744   :  { %v1587_v5 = vpop.f32.mrb[14].mxu1  ;;  %v761_v14 = vadd.f32 %v760_v4, %v722_v3 }
 0x745   :  { %v772_v12 = vadd.f32 %v1587_v5, %v725_v2  ;;  %v763_v13 = vpop.f32.mrb[15].mxu1 }
 0x746   :  { %v764_v15 = vadd.f32 %v763_v13, %v723_v6  ;;  %v1697_v13 = vld [vmem:[%s2141_s9 + $0x8] sm:$0xff]  }
 0x747   :  { %v776_v16 = vpack.c.bf16 %v772_v12, %v769_v11  ;;  %v1696_v12 = vld [vmem:[%s2141_s9] sm:$0xff]  }
 0x748   :  { %v775_v17 = vpack.c.bf16 %v764_v15, %v761_v14  ;;  %v1698_v14 = vld [vmem:[%s2141_s9 + $0x10] sm:$0xff]   ;;  %v1699_v15 = vld [vmem:[%s2141_s9 + $0x18] sm:$0xff]  }
 0x74a   :  { %1596 = vmatprep.mubr.msk.bf16.mxu1 %vm334_vm4, %v775_v17  ;;  %v1701_v17 = vld [vmem:[%s2141_s9 + $0x28] sm:$0xff]  }
 0x74b   :  { %1597 = vmatmul.mubr.msk.bf16.vlgmr.msra.gmra.mrb[16].mxu1 %vm334_vm4, %v776_v16  ;;  %v1700_v16 = vld [vmem:[%s2141_s9 + $0x20] sm:$0xff]  }
 0x74c   :  { %1620 = vmatprep.mubr.msk.bf16.mxu1 %vm1747_vm5, %v1746_v7  ;;  %1613 = vmatpush3.bf16.msra.mxu1 %v1692_v19  ;;  %v1407_v19 = vld [vmem:[%s2140_s8 + $0x1] ss:$0 sm:$0xff] }
 0x74d   :  { %1614 = vmatprep.subr.bf16.mxu1 %v1746_v7 }
 0x750   :  { %1615 = vmatpush3.bf16.msra.mxu1 %v1693_v55 }
 0x751   :  { %1616 = vmatprep.subr.bf16.mxu1 %v1746_v7 }
 0x754   :  { %1617 = vmatpush3.bf16.msra.mxu1 %v1694_v62 }
 0x755   :  { %1618 = vmatprep.subr.bf16.mxu1 %v1746_v7 }
 0x758   :  { %1619 = vmatpush3.bf16.msra.mxu1 %v1695_v63 }
 0x759   :  { %1644 = vmatprep.subr.bf16.mxu1 %v1746_v7 }
 0x81e   :  { %v1598_v21 = vpop.f32.mrb[16].mxu1 }
 0x81f   :  { %v867_v22 = vadd.f32 %v1598_v21, %v1385_v20  ;;  %v858_v23 = vpop.f32.mrb[17].mxu1 }
 0x820   :  { %v859_v24 = vadd.f32 %v1385_v20, %v858_v23  ;;  %v1599_v25 = vpop.f32.mrb[18].mxu1 }
 0x821   :  { %v875_v26 = vmax.f32 %v867_v22, 0.0  ;;  %v870_v27 = vadd.f32 %v1599_v25, %v1385_v20  ;;  %v861_v28 = vpop.f32.mrb[19].mxu1  ;;  %v1706_v22 = vld [vmem:[%s2143_s11 + $0x10] sm:$0xff]  }
 0x822   :  { %v873_v29 = vmax.f32 %v859_v24, 0.0  ;;  %v862_v30 = vadd.f32 %v1385_v20, %v861_v28  ;;  %v1709_v28 = vld [vmem:[%s2143_s11 + $0x28] sm:$0xff]  }
 0x823   :  { %v879_v31 = vadd.f32 %v875_v26, %v1957_v57  ;;  %v876_v32 = vmax.f32 %v870_v27, 0.0  ;;  %v1707_v26 = vld [vmem:[%s2143_s11 + $0x18] sm:$0xff]   ;;  %v1708_v27 = vld [vmem:[%s2143_s11 + $0x20] sm:$0xff]  }
 0x824   :  { %v877_v33 = vadd.f32 %v873_v29, %v1951_v53  ;;  %v874_v34 = vmax.f32 %v862_v30, 0.0  ;;  %v1076_v29 = vld [vmem:[%s2134_s2] sm:$0x3] }
 0x825   :  { %v880_v35 = vadd.f32 %v876_v32, %v1953_v54  ;;  %v890_v37 = vsel %vm334_vm4, %v879_v31, 0.0 }
 0x826   :  { %v878_v36 = vadd.f32 %v874_v34, %v1955_v56  ;;  %v881_v39 = vsel %vm334_vm4, %v877_v33, 0.0  ;;  %v1710_v33 = vld [vmem:[%s2143_s11 + $0x30] sm:$0xff]   ;;  %v1711_v34 = vld [vmem:[%s2143_s11 + $0x38] sm:$0xff]  }
 0x827   :  { %v891_v38 = vsel %vm334_vm4, %v880_v35, 0.0  ;;  %v1413_v35 = vld [vmem:[%s2142_s10] ss:$0 sm:$0xff]  ;;  %s1720_s10 = scalar_lea.vmem %s1317_s29, 32 }
 0x828   :  { %v892_v40 = vadd.f32 %v891_v38, %v890_v37  ;;  %v882_v41 = vsel %vm334_vm4, %v878_v36, 0.0  ;;  %p1721_p0 = scmp.ne.s32.totalorder %s1317_s29, %s1720_s10  ;;  %p1726_p2 = scmp.lt.s32.totalorder %s1720_s10, %s1720_s10 }
 0x829   :  { %v883_v42 = vadd.f32 %v882_v41, %v881_v39 }
 0x82a   :  { %v893_v43 = vrot.slane %v892_v40, 4  ;;  %p1727_p3 = por %p1726_p2, %p1725_p1 }
 0x82b   :  { %v884_v44 = vrot.slane %v883_v42, 4 }
 0x82c   :  { %v894_v45 = vadd.f32 %v893_v43, %v892_v40  ;;  %p1728_p4 = pnand %p1727_p3, %p1721_p0 }
 0x82d   :  { %v885_v46 = vadd.f32 %v884_v44, %v883_v42 }
 0x82e   :  { %v895_v47 = vrot.slane %v894_v45, 2 }
 0x82f   :  { %v886_v48 = vrot.slane %v885_v46, 2 }
 0x830   :  { %v896_v49 = vadd.f32 %v895_v47, %v894_v45 }
 0x831   :  { %v887_v50 = vadd.f32 %v886_v48, %v885_v46 }
 0x832   :  { %v897_v51 = vrot.slane %v896_v49, 1 }
 0x833   :  { %v888_v52 = vrot.slane %v887_v50, 1 }
 0x834   :  { %v898_v53 = vadd.f32 %v897_v51, %v896_v49 }
 0x835   :  { %v889_v54 = vadd.f32 %v888_v52, %v887_v50 }
 0x836   :  { %v900_v56 = vpack.c.bf16 %v898_v53, %v898_v53 }
 0x837   :  { %v899_v57 = vpack.c.bf16 %v889_v54, %v889_v54 }
 0x838   :  { %v919_v58 = vunpack.c.l.b16 %v900_v56 }
 0x839   :  { %v918_v59 = vunpack.c.l.b16 %v899_v57 }
 0x83b   :  { %v920_v60 = vsel %vm105_vm6, %v919_v58, %v918_v59 }
 0x83c   :  { %v921_v61 = vpack.c.b16 %v920_v60, %v920_v60 }
 0x83e   :  { %1609 = vmatmul.mubr.msk.bf16.vlgmr.msra.gmra.mrb[16].mxu0 %vm334_vm4, %v921_v61 }
 0x83f   :  { %1640 = vmatprep.mubr.msk.bf16.mxu0 %vm1747_vm5, %v1746_v7  ;;  %1625 = vmatpush3.bf16.msra.mxu0 %v1696_v12 }
 0x840   :  { %1626 = vmatprep.subr.bf16.mxu0 %v1746_v7 }
 0x843   :  { %1627 = vmatpush3.bf16.msra.mxu0 %v1697_v13 }
 0x844   :  { %1628 = vmatprep.subr.bf16.mxu0 %v1746_v7 }
 0x847   :  { %1629 = vmatpush3.bf16.msra.mxu0 %v1698_v14 }
 0x848   :  { %1630 = vmatprep.subr.bf16.mxu0 %v1746_v7 }
 0x84b   :  { %1631 = vmatpush3.bf16.msra.mxu0 %v1699_v15 }
 0x84c   :  { %1632 = vmatprep.subr.bf16.mxu0 %v1746_v7 }
 0x84f   :  { %1633 = vmatpush3.bf16.msra.mxu0 %v1700_v16 }
 0x850   :  { %1634 = vmatprep.subr.bf16.mxu0 %v1746_v7 }
 0x853   :  { %1635 = vmatpush3.bf16.msra.mxu0 %v1701_v17 }
 0x854   :  { %1636 = vmatprep.subr.bf16.mxu0 %v1746_v7 }
 0x857   :  { %1637 = vmatpush3.bf16.msra.mxu0 %v1702_v9 }
 0x858   :  { %1638 = vmatprep.subr.bf16.mxu0 %v1746_v7 }
 0x85b   :  { %1639 = vmatpush3.bf16.msra.mxu0 %v1703_v8 }
 0x911   :  { %v983_v1 = vpop.f32.mrb[16].mxu0 }
 0x912   :  { %v984_v4 = vadd.f32 %v1392_v0, %v983_v1  ;;  %v1610_v2 = vpop.f32.mrb[17].mxu0 }
 0x913   :  { %v986_v3 = vpop.f32.mrb[18].mxu0 }
 0x914   :  { %v989_v5 = vmax.f32 %v984_v4, 0.0  ;;  %v1611_v6 = vpop.f32.mrb[19].mxu0 }
 0x916   :  { %v990_v11 = vpack.c.bf16 %v989_v5, %v989_v5 }
 0x918   :  { %1621 = vmatmul.mubr.msk.bf16.vlgmr.msra.gmra.mrb[20].mxu1 %vm334_vm4, %v990_v11 }
 0x919   :  { %1660 = vmatprep.mubr.msk.bf16.mxu1 %vm1747_vm5, %v1746_v7  ;;  %1645 = vmatpush3.bf16.msra.mxu1 %v1704_v10 }
 0x91a   :  { %1646 = vmatprep.subr.bf16.mxu1 %v1746_v7 }
 0x91d   :  { %1647 = vmatpush3.bf16.msra.mxu1 %v1705_v18 }
 0x91e   :  { %1648 = vmatprep.subr.bf16.mxu1 %v1746_v7 }
 0x921   :  { %1649 = vmatpush3.bf16.msra.mxu1 %v1706_v22 }
 0x922   :  { %1650 = vmatprep.subr.bf16.mxu1 %v1746_v7 }
 0x925   :  { %1651 = vmatpush3.bf16.msra.mxu1 %v1707_v26 }
 0x926   :  { %1652 = vmatprep.subr.bf16.mxu1 %v1746_v7 }
 0x929   :  { %1653 = vmatpush3.bf16.msra.mxu1 %v1708_v27 }
 0x92a   :  { %1654 = vmatprep.subr.bf16.mxu1 %v1746_v7 }
 0x92d   :  { %1655 = vmatpush3.bf16.msra.mxu1 %v1709_v28 }
 0x92e   :  { %1656 = vmatprep.subr.bf16.mxu1 %v1746_v7 }
 0x931   :  { %1657 = vmatpush3.bf16.msra.mxu1 %v1710_v33 }
 0x932   :  { %1658 = vmatprep.subr.bf16.mxu1 %v1746_v7  ;;  %v1422_v7 = vld [vmem:[%s2144_s12] ss:$0 sm:$0xff] }
 0x935   :  { %1659 = vmatpush3.bf16.msra.mxu1 %v1711_v34 }
 0x9eb   :  { %v1069_v55 = vpop.f32.mrb[20].mxu1 }
 0x9ec   :  { %v1070_v20 = vadd.f32 %v1407_v19, %v1069_v55  ;;  %v1622_v21 = vpop.f32.mrb[21].mxu1 }
 0x9ed   :  { %v1072_v23 = vpop.f32.mrb[22].mxu1 }
 0x9ee   :  { %v1075_v24 = vmax.f32 %v1070_v20, 0.0  ;;  %v1623_v25 = vpop.f32.mrb[23].mxu1 }
 0x9f0   :  { %1078 = vrot.lane.b32.xlu1 %v1075_v24, %s1748_s19 }
 0xa62   :  { %v1079_v30 = vpop.permute.xlu1 %1078 }
 0xa63   :  { %v1081_v31 = vsel %vm334_vm4, %v1076_v29, %v1079_v30 }
 0xa64   :  { %v1082_v32 = vpack.c.bf16 %v1081_v31, %v1081_v31 }
 0xa66   :  { %1641 = vmatmul.mubr.bf16.vlgmr.msra.gmra.mrb[20].mxu0 %v1082_v32 }
 0xb39   :  { %v1188_v36 = vpop.f32.mrb[20].mxu0 }
 0xb3a   :  { %v1189_v37 = vadd.f32 %v1413_v35, %v1188_v36  ;;  %v1642_v38 = vpop.f32.mrb[21].mxu0 }
 0xb3b   :  { %v1191_v39 = vpop.f32.mrb[22].mxu0 }
 0xb3c   :  { %v1194_v40 = vmax.f32 %v1189_v37, 0.0  ;;  %v1643_v41 = vpop.f32.mrb[23].mxu0 }
 0xb3e   :  { %v1195_v42 = vpack.c.bf16 %v1194_v40, %v1194_v40 }
 0xb40   :  { %1661 = vmatmul.mubr.bf16.vlgmr.msra.gmra.mrb[24].mxu1 %v1195_v42 }
 0xc13   :  { %v1301_v43 = vpop.f32.mrb[24].mxu1 }
 0xc14   :  { %v1302_v44 = vadd.f32 %v1422_v7, %v1301_v43  ;;  %v1662_v45 = vpop.f32.mrb[25].mxu1 }
 0xc15   :  { %v1304_v46 = vpop.f32.mrb[26].mxu1 }
 0xc16   :  { %v1663_v47 = vpop.f32.mrb[27].mxu1  ;;  %v1308_v48 = vsel %vm1307_vm7, %v1302_v44, 0.0 }
 0xc17   :  { %1309 = vst [vmem:[#allocation3] sm:$0x3] %v1308_v48 }
 0xc18   :  { %1731 = shalt.err (!%p1728_p4)
}
 0xc19   :  { %s1732_s30 = scalar_lea.hbm %s2145_s13, 32 }
 0xc1a   :  { %p1733_p5 = scmp.ne.s32.totalorder %s2145_s13, %s1732_s30  ;;  %p1736_p6 = scmp.lt.u32.totalorder %s1732_s30, %s2145_s13 }
 0xc1c   :  { %p1738_p7 = pnand %p1736_p6, %p1733_p5 }
 0xc1e   :  { %1741 = shalt.err (!%p1738_p7)
}
 0xc1f   :  { %1319 = dma.vmem_to_hbm [thread:$0]  %s1317_s29, 32, %s2145_s13, [#allocation4]  }
 0xc20   :  { %1742 = dma.done.wait [#allocation4], 32  }
 0xc21   :  { %1743 = vsyncadd [#allocation4], 4294967264 }
 0xc22   :  { %1323 = vsyncpa [#allocation4], 1 }

</bundles_post_ra>
